<compile_context>
chip_gen: v7x
topology: tpu7x:2x2x1
jax: 0.10.0
libtpu: 0.0.40
codegen_flags: <defaults>
</compile_context>

<pallas_src>
import jax
import jax.numpy as jnp
from jax.experimental import pallas as pl
from jax.experimental.pallas import tpu as pltpu


# ----------------------------------------------------------------------------
# Kernel: whole-array (optionally chunked) HBM -> HBM DMA.
# ----------------------------------------------------------------------------
def _make_dma_identity_kernel(chunk_bounds):
    """Build a kernel that copies x_hbm -> o_hbm via async DMA.

    chunk_bounds: list of static (start, end) slices along the leading axis.
    All chunk DMAs are started before any is waited on, so they overlap.
    """
    n_chunks = len(chunk_bounds)

    def kernel(x_hbm, o_hbm, sem):
        if n_chunks == 1:
            cp = pltpu.make_async_copy(x_hbm, o_hbm, sem.at[0])
            cp.start()
            cp.wait()
        else:
            copies = []
            for i, (s, e) in enumerate(chunk_bounds):
                cp = pltpu.make_async_copy(x_hbm.at[s:e], o_hbm.at[s:e], sem.at[i])
                cp.start()
                copies.append(cp)
            for cp in copies:
                cp.wait()

    return kernel


def _chunk_bounds(leading, n_chunks):
    n = max(1, min(int(n_chunks), int(leading)))
    base, rem = divmod(int(leading), n)
    bounds, start = [], 0
    for i in range(n):
        end = start + base + (1 if i < rem else 0)
        bounds.append((start, end))
        start = end
    return bounds


def identity_pallas(x: jax.Array, *, max_chunks: int = 4,
                    chunk_threshold_bytes: int = 8 * 1024 * 1024) -> jax.Array:
    """Identity via a direct HBM->HBM DMA kernel (no VMEM staging, no tiling)."""
    if x.ndim == 0 or x.size == 0:
        return x  # nothing to DMA; launching a kernel is pure overhead

    itemsize = jnp.dtype(x.dtype).itemsize
    nbytes = int(x.size) * int(itemsize)

    # Only chunk (to overlap a few DMA streams) when the array is large.
    n_chunks = max_chunks if nbytes >= chunk_threshold_bytes else 1
    bounds = _chunk_bounds(x.shape[0], n_chunks)

    kernel = _make_dma_identity_kernel(bounds)

    return pl.pallas_call(
        kernel,
        out_shape=jax.ShapeDtypeStruct(x.shape, x.dtype),
        in_specs=[pl.BlockSpec(memory_space=pl.ANY)],
        out_specs=pl.BlockSpec(memory_space=pl.ANY),
        scratch_shapes=[pltpu.SemaphoreType.DMA((len(bounds),))],
        cost_estimate=pl.CostEstimate(
            flops=0, transcendentals=0, bytes_accessed=2 * nbytes),
    )(x)


def identity(x: jax.Array, *, force_kernel: bool = False) -> jax.Array:
    """Identity.forward(x) == x.

    Default path: metadata-only pass-through (no HBM traffic at all), per the
    performance review.  Set force_kernel=True when a custom call must exist;
    that routes through the HBM->HBM DMA Pallas kernel.
    """
    if not force_kernel:
        return x
    return identity_pallas(x)


if __name__ == "__main__":
    key = jax.random.PRNGKey(0)
    k0, k1, k2 = jax.random.split(key, 3)

    # 1) Default path: pure pass-through (zero-copy identity).
    x_main = jax.random.normal(k0, (2, 4, 16, 16), dtype=jnp.float32)
    y_passthrough = jax.block_until_ready(identity(x_main))
    assert y_passthrough.shape == x_main.shape and y_passthrough.dtype == x_main.dtype
    assert bool(jnp.all(y_passthrough == x_main))

    # 2) Kernel path: single HBM->HBM DMA on the same NCHW-style input.
    y_kernel = jax.block_until_ready(identity(x_main, force_kernel=True))
    assert y_kernel.shape == x_main.shape and y_kernel.dtype == x_main.dtype
    assert bool(jnp.all(y_kernel == x_main))

    # 3) Kernel path with forced multi-chunk overlapping DMAs (exercise the
    #    chunked branch at small scale by lowering the threshold).
    x_chunked = jax.random.normal(k1, (3, 5, 16, 16), dtype=jnp.float32)
    y_chunked = jax.block_until_ready(
        identity_pallas(x_chunked, max_chunks=3, chunk_threshold_bytes=0))
    assert y_chunked.shape == x_chunked.shape and y_chunked.dtype == x_chunked.dtype
    assert bool(jnp.all(y_chunked == x_chunked))

    # 4) Dtype-agnostic: bf16 through the single-DMA kernel path.
    x_bf16 = jax.random.normal(k2, (2, 8, 16, 128), dtype=jnp.bfloat16)
    y_bf16 = jax.block_until_ready(identity(x_bf16, force_kernel=True))
    assert y_bf16.dtype == x_bf16.dtype and bool(jnp.all(y_bf16 == x_bf16))

    # 5) 0-d input: bypass even when a kernel is requested.
    x_scalar = jnp.float32(1.5)
    assert bool(identity(x_scalar, force_kernel=True) == x_scalar)

    print("KERNEL_OK")
</pallas_src>

<mosaic_0001>
module attributes {stable_mosaic.version = 11 : i64} {
  func.func @kernel(%arg0: memref<2x4x16x16xf32, #tpu.memory_space<any>>, %arg1: memref<2x4x16x16xf32, #tpu.memory_space<any>>, %arg2: memref<1x!tpu.dma_semaphore, #tpu.memory_space<semaphore_mem>>) attributes {dimension_semantics = [], scalar_prefetch = 0 : i64, scratch_operands = 1 : i64, tpu.core_type = #tpu.core_type<tc>} {
    %c0_i32 = arith.constant 0 : i32
    %0 = tpu.memref_slice %arg2[%c0_i32] : memref<1x!tpu.dma_semaphore, #tpu.memory_space<semaphore_mem>> -> memref<1x!tpu.dma_semaphore, #tpu.memory_space<semaphore_mem>>
    %1 = tpu.memref_squeeze %0 : memref<1x!tpu.dma_semaphore, #tpu.memory_space<semaphore_mem>> -> memref<!tpu.dma_semaphore, #tpu.memory_space<semaphore_mem>>
    tpu.enqueue_dma source(%arg0 : memref<2x4x16x16xf32, #tpu.memory_space<any>>) target(%arg1 : memref<2x4x16x16xf32, #tpu.memory_space<any>>) target_semaphore(%1 : memref<!tpu.dma_semaphore, #tpu.memory_space<semaphore_mem>>)
    %c0_i32_0 = arith.constant 0 : i32
    %2 = tpu.memref_slice %arg2[%c0_i32_0] : memref<1x!tpu.dma_semaphore, #tpu.memory_space<semaphore_mem>> -> memref<1x!tpu.dma_semaphore, #tpu.memory_space<semaphore_mem>>
    %3 = tpu.memref_squeeze %2 : memref<1x!tpu.dma_semaphore, #tpu.memory_space<semaphore_mem>> -> memref<!tpu.dma_semaphore, #tpu.memory_space<semaphore_mem>>
    tpu.wait_dma2 semaphore(%3 : memref<!tpu.dma_semaphore, #tpu.memory_space<semaphore_mem>>) src(%arg0 : memref<2x4x16x16xf32, #tpu.memory_space<any>>) dst(%arg1 : memref<2x4x16x16xf32, #tpu.memory_space<any>>)
    return
  }
}

</mosaic_0001>

<bundles_post_ra>
// kernel: tpu_custom_call.1
= control target key start
LH: loop header
LB: loop body
LE: loop exit
PB: predicated region body
PF: predicated region fallthrough
CT: control target
= control target key end

     0   :  { %s36_s6 = smov [#allocation2]   ;;  %s37_s7 = smov [#allocation3]   ;;  %s55_s0 = inlined_call_operand.hbm [shape: f32[2,4,16,16], index: 0, kind: input, shape index: {}]   ;;  %s56_s1 = inlined_call_operand.hbm [shape: f32[2,4,16,16], index: 1, kind: output, shape index: {}]  }
   0x1   :  { %s38_s8 = smov 0  }
   0x2   :  { %18 = dma.general %s55_s0, 2048, %s56_s1, %s36_s6, %s37_s7, [#allocation4], %s38_s8, 0  }
   0x3   :  { %34 = dma.done.wait [#allocation2], 2048 }
   0x4   :  { %35 = vsyncadd [#allocation2], 4294965248 }
   0x5   :  { %24 = vsyncmov [#allocation2] }
   0x8   :  { %s25_s13 = vpop.sfrf %24 }
   0x9   :  { %p30_p0 = scmp.ne.s32.totalorder %s25_s13, 0 }
   0xb   :  { %29 = shalt.err (%p30_p0)  }

</bundles_post_ra>
